<compile_context>
chip_gen: v6e
topology: v6e:2x2x1
jax: 0.10.0
libtpu: 0.0.40
codegen_flags: <defaults>
</compile_context>

<pallas_src>
import math

import jax
import jax.numpy as jnp
import numpy as np
from jax.experimental import pallas as pl
from jax.experimental.pallas import tpu as pltpu


# ----------------------------------------------------------------------------
# Kernel helpers
# ----------------------------------------------------------------------------
def _edge_masks(L):
    """(1,1,L) lane masks for per-sample conv padding (blocks hold whole
    samples along the last axis, so no modulo is needed)."""
    lane = jax.lax.broadcasted_iota(jnp.int32, (1, 1, L), 2)
    return lane == 0, lane == (L - 1)


def _stack3(u, left, right):
    """k=3 / pad=1 im2col: [u[.,l-1]; u[.,l]; u[.,l+1]] stacked on channels."""
    L = u.shape[-1]
    u_lm1 = jnp.where(left, 0.0, pltpu.roll(u, 1, axis=2))
    u_rp1 = jnp.where(right, 0.0, pltpu.roll(u, L - 1, axis=2))
    return jnp.concatenate([u_lm1, u, u_rp1], axis=1)        # (bt, 3C, L)


def _bconv(stack_f32, w_ref, b_ref):
    """Per-sample k=3 conv as a batched MXU matmul (bf16 feeds, f32 acc)."""
    bt = stack_f32.shape[0]
    w = w_ref[...]                                            # (Co, 3Ci), MXU dtype
    wb = jnp.broadcast_to(w, (bt,) + w.shape)                 # hoisted, once per body
    y = jnp.einsum("bok,bkl->bol", wb, stack_f32.astype(w.dtype),
                   preferred_element_type=jnp.float32)
    return y + b_ref[...][None]                               # f32 bias add


# ----------------------------------------------------------------------------
# Kernels
# ----------------------------------------------------------------------------
def _stride1_kernel(x_ref, w1_ref, b1_ref, w2_ref, b2_ref, o_ref):
    x = x_ref[...].astype(jnp.float32)                        # (bt, Cin, L)
    left, right = _edge_masks(x.shape[-1])

    h = jnp.maximum(_bconv(_stack3(x, left, right), w1_ref, b1_ref), 0.0)
    y = _bconv(_stack3(h, left, right), w2_ref, b2_ref)
    o_ref[...] = jnp.maximum(y + x, 0.0).astype(o_ref.dtype)  # identity residual


def _stride2_kernel(x_ref, wc_ref, bc_ref, w2_ref, b2_ref, o_ref):
    x = x_ref[...].astype(jnp.float32)                        # (bt, Cin, L)
    bt, cin, L = x.shape
    cout, lout = o_ref.shape[1], o_ref.shape[2]
    left, right = _edge_masks(L)

    # conv1 (stride 1) and downSample share the same im2col stack of x
    # -> one fused matmul with [w1; wd] packed along output channels.
    combo = _bconv(_stack3(x, left, right), wc_ref, bc_ref)   # (bt, Cin+Cout, L)
    h = jnp.maximum(combo[:, :cin, :], 0.0)                   # relu(conv1(x))
    yd = combo[:, cin:, :]                                    # downSample(x) @ full res

    y2 = _bconv(_stack3(h, left, right), w2_ref, b2_ref)      # conv2 @ full res
    yf = jnp.maximum(y2 + yd, 0.0)                            # (bt, Cout, L)

    # A stride-2 (k=3, p=1) conv equals the full-res stride-1 conv sampled at
    # even columns; pick them with an exact 0/1 selection matmul (MXU has
    # large slack at these channel counts; avoids strided lane slicing).
    r = jax.lax.broadcasted_iota(jnp.int32, (L, lout), 0)
    c = jax.lax.broadcasted_iota(jnp.int32, (L, lout), 1)
    sel = (r == 2 * c).astype(jnp.float32)
    y = jnp.dot(yf.reshape(bt * cout, L), sel,
                preferred_element_type=jnp.float32)
    o_ref[...] = y.reshape(bt, cout, lout).astype(o_ref.dtype)


# ----------------------------------------------------------------------------
# Wrapper (mirrors BasicBlock.forward)
# ----------------------------------------------------------------------------
def _pack_w(w):
    """torch Conv1d weight (Cout, Cin, 3) -> (Cout, 3*Cin), tap-major K rows."""
    cout, cin, k = w.shape
    return jnp.transpose(w, (0, 2, 1)).reshape(cout, k * cin)


def _device_budget():
    """Generation-aware (tile budget, scoped-VMEM request, megacore flag)."""
    try:
        kind = jax.devices()[0].device_kind.lower()
    except Exception:
        kind = ""
    if "v7" in kind:                   # 64 MiB VMEM, 2 TensorCores
        return 28 << 20, 40 << 20, True
    if "v5" in kind or "v6" in kind:   # 128 MiB VMEM, 1 TensorCore
        return 48 << 20, 64 << 20, False
    return 8 << 20, None, False        # conservative fallback (older gens)


def _pick_batch_tile(n, bytes_per_sample, budget, two_tc):
    divs = [d for d in range(1, n + 1) if n % d == 0]
    fit = [d for d in divs if d * bytes_per_sample <= budget] or [1]
    if two_tc:
        # keep >=2 (ideally even) grid steps so both TensorCores get work
        pref = ([d for d in fit if n // d >= 2 and (n // d) % 2 == 0]
                or [d for d in fit if n // d >= 2] or fit)
    else:
        pref = fit                     # single TC: the largest tile wins
    return max(pref)


def _compiler_params(vmem_limit):
    kw = dict(dimension_semantics=("parallel",))
    if vmem_limit is not None:
        kw["vmem_limit_bytes"] = vmem_limit
    return pltpu.CompilerParams(**kw)


def basic_block_forward(x, params, in_plane, out_plane, stride=1,
                        mxu_dtype=jnp.bfloat16):
    """BasicBlock forward.  bf16 MXU feeds (f32 accumulation) are the
    performance default; pass mxu_dtype=jnp.float32 for tighter accuracy."""
    if in_plane != out_plane:
        stride = 2
    N, Cin, L = x.shape
    assert Cin == in_plane
    Cout = out_plane

    budget, vmem_limit, two_tc = _device_budget()
    cparams = _compiler_params(vmem_limit)

    w1 = _pack_w(params["w1"]).astype(mxu_dtype)              # (Cin, 3Cin)
    w2 = _pack_w(params["w2"]).astype(mxu_dtype)              # (Cout, 3Cin)
    b1 = params["b1"].reshape(Cin, 1).astype(jnp.float32)
    b2 = params["b2"].reshape(Cout, 1).astype(jnp.float32)

    if stride == 1:
        # rough per-sample VMEM: double-buffered x/out blocks + f32 temporaries
        bps = 4 * L * (13 * Cin + 4 * Cout)
        bt = _pick_batch_tile(N, bps, budget, two_tc)
        return pl.pallas_call(
            _stride1_kernel,
            out_shape=jax.ShapeDtypeStruct((N, Cout, L), x.dtype),
            grid=(N // bt,),
            in_specs=[
                pl.BlockSpec((bt, Cin, L), lambda i: (i, 0, 0)),
                pl.BlockSpec((Cin, 3 * Cin), lambda i: (0, 0)),
                pl.BlockSpec((Cin, 1), lambda i: (0, 0)),
                pl.BlockSpec((Cout, 3 * Cin), lambda i: (0, 0)),
                pl.BlockSpec((Cout, 1), lambda i: (0, 0)),
            ],
            out_specs=pl.BlockSpec((bt, Cout, L), lambda i: (i, 0, 0)),
            compiler_params=cparams,
        )(x, w1, b1, w2, b2)

    # ---- stride == 2 (in_plane != out_plane): extra downsample conv --------
    Lout = (L - 1) // 2 + 1                                   # conv k=3 s=2 p=1
    wd = _pack_w(params["wd"]).astype(mxu_dtype)              # (Cout, 3Cin)
    bd = params["bd"].reshape(Cout, 1).astype(jnp.float32)
    wc = jnp.concatenate([w1, wd], axis=0)                    # (Cin+Cout, 3Cin)
    bc = jnp.concatenate([b1, bd], axis=0)                    # (Cin+Cout, 1)

    bps = 4 * L * (14 * Cin + 6 * Cout)
    bt = _pick_batch_tile(N, bps, budget, two_tc)
    return pl.pallas_call(
        _stride2_kernel,
        out_shape=jax.ShapeDtypeStruct((N, Cout, Lout), x.dtype),
        grid=(N // bt,),
        in_specs=[
            pl.BlockSpec((bt, Cin, L), lambda i: (i, 0, 0)),
            pl.BlockSpec((Cin + Cout, 3 * Cin), lambda i: (0, 0)),
            pl.BlockSpec((Cin + Cout, 1), lambda i: (0, 0)),
            pl.BlockSpec((Cout, 3 * Cin), lambda i: (0, 0)),
            pl.BlockSpec((Cout, 1), lambda i: (0, 0)),
        ],
        out_specs=pl.BlockSpec((bt, Cout, Lout), lambda i: (i, 0, 0)),
        compiler_params=cparams,
    )(x, wc, bc, w2, b2)


# ----------------------------------------------------------------------------
# Pure-JAX reference (for verification)
# ----------------------------------------------------------------------------
def _conv1d_ref(x, w, b, stride):
    y = jax.lax.conv_general_dilated(
        x, w, window_strides=(stride,), padding=((1, 1),),
        dimension_numbers=("NCH", "OIH", "NCH"),
        precision=jax.lax.Precision.HIGHEST)
    return y + b[None, :, None]


def basic_block_ref(x, params, in_plane, out_plane, stride=1):
    if in_plane != out_plane:
        stride = 2
    h = jax.nn.relu(_conv1d_ref(x, params["w1"], params["b1"], 1))
    c = _conv1d_ref(h, params["w2"], params["b2"], stride)
    if stride == 1:
        y = c + x
    else:
        y = _conv1d_ref(x, params["wd"], params["bd"], stride) + c
    return jax.nn.relu(y)


# ----------------------------------------------------------------------------
# Deterministic parameter init (torch Conv1d-style uniform bounds)
# ----------------------------------------------------------------------------
def _init_conv(key, cout, cin, k=3):
    k1, k2 = jax.random.split(key)
    bound = 1.0 / math.sqrt(cin * k)
    w = jax.random.uniform(k1, (cout, cin, k), jnp.float32, -bound, bound)
    b = jax.random.uniform(k2, (cout,), jnp.float32, -bound, bound)
    return w, b


def make_params(key, in_plane, out_plane):
    k1, k2, k3 = jax.random.split(key, 3)
    w1, b1 = _init_conv(k1, in_plane, in_plane)
    w2, b2 = _init_conv(k2, out_plane, in_plane)
    params = {"w1": w1, "b1": b1, "w2": w2, "b2": b2}
    if in_plane != out_plane:
        wd, bd = _init_conv(k3, out_plane, in_plane)
        params["wd"] = wd
        params["bd"] = bd
    return params


if __name__ == "__main__":
    key = jax.random.PRNGKey(0)
    kx, kp1, kp2 = jax.random.split(key, 3)

    N, L = 2, 128
    # bf16 MXU feeds are the performance default; the tolerance reflects bf16
    # input quantization (accumulation stays in f32, so the error is small).
    RTOL, ATOL = 2e-2, 5e-2

    # Case 1: in_plane == out_plane -> stride 1, identity residual
    Cin = Cout = 8
    x1 = jax.random.normal(kx, (N, Cin, L), jnp.float32)
    p1 = make_params(kp1, Cin, Cout)
    ref1 = basic_block_ref(x1, p1, Cin, Cout)
    out1 = jax.block_until_ready(basic_block_forward(x1, p1, Cin, Cout))
    assert out1.shape == (N, Cout, L)
    np.testing.assert_allclose(np.asarray(out1), np.asarray(ref1),
                               rtol=RTOL, atol=ATOL)
    # also exercise the f32 accuracy knob (tolerance kept conservative so the
    # check is robust to platform matmul-precision defaults)
    out1_f32 = jax.block_until_ready(
        basic_block_forward(x1, p1, Cin, Cout, mxu_dtype=jnp.float32))
    np.testing.assert_allclose(np.asarray(out1_f32), np.asarray(ref1),
                               rtol=RTOL, atol=ATOL)

    # Case 2: in_plane != out_plane -> stride 2 + downsample conv
    Cin, Cout = 8, 16
    x2 = jax.random.normal(kx, (N, Cin, L), jnp.float32)
    p2 = make_params(kp2, Cin, Cout)
    ref2 = basic_block_ref(x2, p2, Cin, Cout)
    out2 = jax.block_until_ready(basic_block_forward(x2, p2, Cin, Cout))
    assert out2.shape == (N, Cout, L // 2)
    np.testing.assert_allclose(np.asarray(out2), np.asarray(ref2),
                               rtol=RTOL, atol=ATOL)

    print("KERNEL_OK")
</pallas_src>

<mosaic_0001>
module attributes {stable_mosaic.version = 11 : i64} {
  func.func @_stride1_kernel(%arg0: i32, %arg1: memref<2x8x128xf32, #tpu.memory_space<vmem>>, %arg2: memref<8x24xbf16, #tpu.memory_space<vmem>>, %arg3: memref<8x1xf32, #tpu.memory_space<vmem>>, %arg4: memref<8x24xbf16, #tpu.memory_space<vmem>>, %arg5: memref<8x1xf32, #tpu.memory_space<vmem>>, %arg6: memref<2x8x128xf32, #tpu.memory_space<vmem>>) attributes {dimension_semantics = [#tpu.dimension_semantics<parallel>], iteration_bounds = array<i64: 1>, scalar_prefetch = 0 : i64, scratch_operands = 0 : i64, tpu.core_type = #tpu.core_type<tc>, window_params = [{transform_indices = @transform_0, window_bounds = array<i64: 2, 8, 128>}, {pipeline_mode = #tpu.pipeline_mode<synchronous>, transform_indices = @transform_1, window_bounds = array<i64: 8, 24>}, {pipeline_mode = #tpu.pipeline_mode<synchronous>, transform_indices = @transform_2, window_bounds = array<i64: 8, 1>}, {pipeline_mode = #tpu.pipeline_mode<synchronous>, transform_indices = @transform_3, window_bounds = array<i64: 8, 24>}, {pipeline_mode = #tpu.pipeline_mode<synchronous>, transform_indices = @transform_4, window_bounds = array<i64: 8, 1>}, {transform_indices = @transform_5, window_bounds = array<i64: 2, 8, 128>}]} {
    %c0 = arith.constant 0 : index
    %c0_0 = arith.constant 0 : index
    %c0_1 = arith.constant 0 : index
    %0 = vector.load %arg1[%c0, %c0_0, %c0_1] : memref<2x8x128xf32, #tpu.memory_space<vmem>>, vector<2x8x128xf32>
    %1 = tpu.iota {dimensions = array<i32: 2>} : vector<1x1x128xi32>
    %c0_i32 = arith.constant 0 : i32
    %2 = vector.broadcast %c0_i32 : i32 to vector<1x1x128xi32>
    %3 = arith.cmpi eq, %1, %2 : vector<1x1x128xi32>
    %c127_i32 = arith.constant 127 : i32
    %4 = vector.broadcast %c127_i32 : i32 to vector<1x1x128xi32>
    %5 = arith.cmpi eq, %1, %4 : vector<1x1x128xi32>
    %c1_i32 = arith.constant 1 : i32
    %6 = tpu.dynamic_rotate %0 by %c1_i32 dim 2 : vector<2x8x128xf32>, i32 -> vector<2x8x128xf32>
    %cst = arith.constant 0.000000e+00 : f32
    %7 = vector.shape_cast %3 : vector<1x1x128xi1> to vector<1x1x128xi1>
    %8 = vector.broadcast %7 : vector<1x1x128xi1> to vector<2x8x128xi1>
    %9 = vector.broadcast %cst : f32 to vector<2x8x128xf32>
    %10 = arith.select %8, %9, %6 : vector<2x8x128xi1>, vector<2x8x128xf32>
    %c127_i32_2 = arith.constant 127 : i32
    %11 = tpu.dynamic_rotate %0 by %c127_i32_2 dim 2 : vector<2x8x128xf32>, i32 -> vector<2x8x128xf32>
    %cst_3 = arith.constant 0.000000e+00 : f32
    %12 = vector.shape_cast %5 : vector<1x1x128xi1> to vector<1x1x128xi1>
    %13 = vector.broadcast %12 : vector<1x1x128xi1> to vector<2x8x128xi1>
    %14 = vector.broadcast %cst_3 : f32 to vector<2x8x128xf32>
    %15 = arith.select %13, %14, %11 : vector<2x8x128xi1>, vector<2x8x128xf32>
    %16 = tpu.concatenate %10, %0, %15 in 1 : vector<2x8x128xf32>, vector<2x8x128xf32>, vector<2x8x128xf32> -> vector<2x24x128xf32>
    %c0_4 = arith.constant 0 : index
    %c0_5 = arith.constant 0 : index
    %17 = vector.load %arg2[%c0_4, %c0_5] : memref<8x24xbf16, #tpu.memory_space<vmem>>, vector<8x24xbf16>
    %18 = vector.shape_cast %17 : vector<8x24xbf16> to vector<1x8x24xbf16>
    %19 = vector.broadcast %18 : vector<1x8x24xbf16> to vector<2x8x24xbf16>
    %20 = arith.truncf %16 : vector<2x24x128xf32> to vector<2x24x128xbf16>
    "tpu.trace_start"() <{level = 10 : i32, message = "bok,bkl->bol"}> : () -> ()
    %cst_6 = arith.constant dense<0.000000e+00> : vector<2x8x128xf32>
    %21 = tpu.matmul %19, %20, %cst_6 {dimension_numbers = #tpu.dot_dimension_numbers<[2], [1], [1], [2], [0, 0, 0, 1, 1, 2], [0], [0]>} : vector<2x8x24xbf16>, vector<2x24x128xbf16>, vector<2x8x128xf32> -> vector<2x8x128xf32>
    "tpu.trace_stop"() : () -> ()
    %c0_7 = arith.constant 0 : index
    %c0_8 = arith.constant 0 : index
    %22 = vector.load %arg3[%c0_7, %c0_8] : memref<8x1xf32, #tpu.memory_space<vmem>>, vector<8x1xf32>
    %23 = vector.shape_cast %22 : vector<8x1xf32> to vector<1x8x1xf32>
    %24 = vector.broadcast %23 : vector<1x8x1xf32> to vector<2x8x128xf32>
    %25 = arith.addf %21, %24 : vector<2x8x128xf32>
    %cst_9 = arith.constant 0.000000e+00 : f32
    %26 = vector.broadcast %cst_9 : f32 to vector<2x8x128xf32>
    %27 = arith.maximumf %25, %26 : vector<2x8x128xf32>
    %c1_i32_10 = arith.constant 1 : i32
    %28 = tpu.dynamic_rotate %27 by %c1_i32_10 dim 2 : vector<2x8x128xf32>, i32 -> vector<2x8x128xf32>
    %cst_11 = arith.constant 0.000000e+00 : f32
    %29 = vector.shape_cast %3 : vector<1x1x128xi1> to vector<1x1x128xi1>
    %30 = vector.broadcast %29 : vector<1x1x128xi1> to vector<2x8x128xi1>
    %31 = vector.broadcast %cst_11 : f32 to vector<2x8x128xf32>
    %32 = arith.select %30, %31, %28 : vector<2x8x128xi1>, vector<2x8x128xf32>
    %c127_i32_12 = arith.constant 127 : i32
    %33 = tpu.dynamic_rotate %27 by %c127_i32_12 dim 2 : vector<2x8x128xf32>, i32 -> vector<2x8x128xf32>
    %cst_13 = arith.constant 0.000000e+00 : f32
    %34 = vector.shape_cast %5 : vector<1x1x128xi1> to vector<1x1x128xi1>
    %35 = vector.broadcast %34 : vector<1x1x128xi1> to vector<2x8x128xi1>
    %36 = vector.broadcast %cst_13 : f32 to vector<2x8x128xf32>
    %37 = arith.select %35, %36, %33 : vector<2x8x128xi1>, vector<2x8x128xf32>
    %38 = tpu.concatenate %32, %27, %37 in 1 : vector<2x8x128xf32>, vector<2x8x128xf32>, vector<2x8x128xf32> -> vector<2x24x128xf32>
    %c0_14 = arith.constant 0 : index
    %c0_15 = arith.constant 0 : index
    %39 = vector.load %arg4[%c0_14, %c0_15] : memref<8x24xbf16, #tpu.memory_space<vmem>>, vector<8x24xbf16>
    %40 = vector.shape_cast %39 : vector<8x24xbf16> to vector<1x8x24xbf16>
    %41 = vector.broadcast %40 : vector<1x8x24xbf16> to vector<2x8x24xbf16>
    %42 = arith.truncf %38 : vector<2x24x128xf32> to vector<2x24x128xbf16>
    "tpu.trace_start"() <{level = 10 : i32, message = "bok,bkl->bol"}> : () -> ()
    %cst_16 = arith.constant dense<0.000000e+00> : vector<2x8x128xf32>
    %43 = tpu.matmul %41, %42, %cst_16 {dimension_numbers = #tpu.dot_dimension_numbers<[2], [1], [1], [2], [0, 0, 0, 1, 1, 2], [0], [0]>} : vector<2x8x24xbf16>, vector<2x24x128xbf16>, vector<2x8x128xf32> -> vector<2x8x128xf32>
    "tpu.trace_stop"() : () -> ()
    %c0_17 = arith.constant 0 : index
    %c0_18 = arith.constant 0 : index
    %44 = vector.load %arg5[%c0_17, %c0_18] : memref<8x1xf32, #tpu.memory_space<vmem>>, vector<8x1xf32>
    %45 = vector.shape_cast %44 : vector<8x1xf32> to vector<1x8x1xf32>
    %46 = vector.broadcast %45 : vector<1x8x1xf32> to vector<2x8x128xf32>
    %47 = arith.addf %43, %46 : vector<2x8x128xf32>
    %48 = arith.addf %47, %0 : vector<2x8x128xf32>
    %cst_19 = arith.constant 0.000000e+00 : f32
    %49 = vector.broadcast %cst_19 : f32 to vector<2x8x128xf32>
    %50 = arith.maximumf %48, %49 : vector<2x8x128xf32>
    %c0_20 = arith.constant 0 : index
    %c0_21 = arith.constant 0 : index
    %c0_22 = arith.constant 0 : index
    %51 = vector.load %arg6[%c0_20, %c0_21, %c0_22] : memref<2x8x128xf32, #tpu.memory_space<vmem>>, vector<2x8x128xf32>
    tpu.vector_store %arg6[%c0_20, %c0_21, %c0_22], %50 {strides = array<i32>} : memref<2x8x128xf32, #tpu.memory_space<vmem>>, vector<2x8x128xf32>,
    return
  }
  func.func @transform_0(%arg0: i32) -> (i32, i32, i32) {
    %c0_i32 = arith.constant 0 : i32
    %c0_i32_0 = arith.constant 0 : i32
    %c0_i32_1 = arith.constant 0 : i32
    return %arg0, %c0_i32, %c0_i32_0 : i32, i32, i32
  }
  func.func @transform_1(%arg0: i32) -> (i32, i32) {
    %c0_i32 = arith.constant 0 : i32
    %c0_i32_0 = arith.constant 0 : i32
    %c0_i32_1 = arith.constant 0 : i32
    return %c0_i32, %c0_i32_0 : i32, i32
  }
  func.func @transform_2(%arg0: i32) -> (i32, i32) {
    %c0_i32 = arith.constant 0 : i32
    %c0_i32_0 = arith.constant 0 : i32
    %c0_i32_1 = arith.constant 0 : i32
    return %c0_i32, %c0_i32_0 : i32, i32
  }
  func.func @transform_3(%arg0: i32) -> (i32, i32) {
    %c0_i32 = arith.constant 0 : i32
    %c0_i32_0 = arith.constant 0 : i32
    %c0_i32_1 = arith.constant 0 : i32
    return %c0_i32, %c0_i32_0 : i32, i32
  }
  func.func @transform_4(%arg0: i32) -> (i32, i32) {
    %c0_i32 = arith.constant 0 : i32
    %c0_i32_0 = arith.constant 0 : i32
    %c0_i32_1 = arith.constant 0 : i32
    return %c0_i32, %c0_i32_0 : i32, i32
  }
  func.func @transform_5(%arg0: i32) -> (i32, i32, i32) {
    %c0_i32 = arith.constant 0 : i32
    %c0_i32_0 = arith.constant 0 : i32
    %c0_i32_1 = arith.constant 0 : i32
    return %arg0, %c0_i32, %c0_i32_0 : i32, i32, i32
  }
}

</mosaic_0001>

<bundles_post_ra>
// kernel: tpu_custom_call.1
= control target key start
LH: loop header
LB: loop body
LE: loop exit
PB: predicated region body
PF: predicated region fallthrough
CT: control target
= control target key end

     0   :  { %10 = vsyncpa [#allocation3], 0  ;;  %s551_s0 = inlined_call_operand.vmem [shape: f32[2,8,128], index: 0, kind: input, shape index: {}]   ;;  %s552_s1 = inlined_call_operand.hbm [shape: bf16[8,24], index: 1, kind: input, shape index: {}]   ;;  %s553_s2 = inlined_call_operand.vmem [shape: f32[8,1], index: 2, kind: input, shape index: {}]   ;;  %s554_s3 = inlined_call_operand.vmem [shape: bf16[8,24], index: 3, kind: input, shape index: {}]   ;;  %s555_s4 = inlined_call_operand.vmem [shape: f32[8,1], index: 4, kind: input, shape index: {}]   ;;  %s556_s5 = inlined_call_operand.hbm [shape: f32[2,8,128], index: 5, kind: output, shape index: {}]  }
   0x1   :  { %11 = vsyncpa [#allocation4], 0  ;;  %s436_s18 = smov [#allocation2]  }
   0x2   :  { %s20_s19 = sshll.u32 %s436_s18, 4  ;;  %s21_s19 = int_to_ptr.vmem [resolvable:$true] %s20_s19 }
   0x3   :  { %s400_s20 = scalar_lea.vmem %s21_s19, 64  ;;  %p405_p1 = scmp.lt.s32.totalorder %s21_s19, %s21_s19 }
   0x4   :  { %p401_p0 = scmp.ne.s32.totalorder %s21_s19, %s400_s20  ;;  %p406_p2 = scmp.lt.s32.totalorder %s400_s20, %s400_s20 }
   0x6   :  { %p407_p3 = por %p406_p2, %p405_p1 }
   0x8   :  { %p408_p4 = pnand %p407_p3, %p401_p0 }
   0xa   :  { %411 = shalt.err (!%p408_p4)
}
   0xb   :  { %23 = dma.hbm_to_vmem [thread:$0]  %s552_s1, 64, %s21_s19, [#allocation3]  }
   0xc   :  { %432 = dma.done.wait [#allocation3], 64  }
   0xd   :  { %433 = vsyncadd [#allocation3], 4294967232  ;;  %v437_v0 = vmov 0.0   ;;  %v484_v1 = vld [vmem:[%s551_s0] sm:$0xff]  ;;  %v489_v2 = vld [vmem:[%s551_s0 + $0x8] sm:$0xff]  ;;  %vm438_vm0 = vmmov 0   ;;  %v36_v6 = vlaneseq }
   0xe   :  { %328 = vmatprep.subr.bf16.mxu0 %v437_v0  ;;  %336 = vmatprep.subr.bf16.mxu1 %v437_v0  ;;  %v370_v3 = vpack.i.bf16 %v489_v2, %v484_v1  ;;  %s439_s1 = smov 127   ;;  %v61_v4 = vld [vmem:[%s553_s2] sm:$0xff]  ;;  %v440_v5 = vmov 0   ;;  %s441_s0 = smov 1   ;;  %vm71_vm2 = vcmask 1043456   ;;  %vm442_vm4 = vmmov 1  }
   0xf   :  { %332 = vmatprep.mubr.msk.bf16.mxu0 %vm438_vm0, %v437_v0  ;;  %340 = vmatprep.mubr.msk.bf16.mxu1 %vm438_vm0, %v437_v0  ;;  %v37_v7 = vand.u32 127, %v36_v6  ;;  %v56_v23 = vld [vmem:[#allocation2] sm:$0xf]  ;;  %vm67_vm6 = vcmask 195584   ;;  %s443_s6 = smov [#allocation5]  }
  0x10   :  { %371 = vrot.lane.b32.xlu0 %v370_v3, %s439_s1  ;;  %380 = vset.pattern.permute.xlu1 %v440_v5  ;;  %v177_v38 = vld [vmem:[%s555_s4] sm:$0xff]  ;;  %s283_s7 = sshll.u32 %s443_s6, 4  ;;  %s284_s7 = int_to_ptr.vmem [resolvable:$true] %s283_s7 }
  0x11   :  { %391 = vset.pattern.permute.xlu0 %v440_v5  ;;  %64 = vperm.xlu1 %380, %v61_v4   ;;  %vm39_vm1 = vcmp.eq.s32.totalorder %v37_v7, 127  ;;  %vm315_vm3 = vcmp.ne.s32.totalorder %v37_v7, 0  ;;  %v172_v53 = vld [vmem:[%s554_s3] sm:$0xf]  ;;  %s412_s3 = scalar_lea.vmem %s284_s7, 256  ;;  %p417_p6 = scmp.lt.s32.totalorder %s284_s7, %s284_s7 }
  0x12   :  { %vm510_vm5 = vmpackc.low %vm442_vm4, %vm315_vm3  ;;  %p413_p5 = scmp.ne.s32.totalorder %s284_s7, %s412_s3  ;;  %p418_p7 = scmp.lt.s32.totalorder %s412_s3, %s412_s3 }
  0x14   :  { %376 = vrot.lane.b32.xlu0 %v370_v3, %s441_s0  ;;  %p419_p8 = por %p418_p7, %p417_p6 }
  0x16   :  { %p420_p9 = pnand %p419_p8, %p413_p5 }
  0x82   :  { %v372_v8 = vpop.permute.xlu0 %371 }
  0x83   :  { %v374_v9 = vunpack.i.h.bf16 %v372_v8  ;;  %v373_v10 = vunpack.i.l.bf16 %v372_v8 }
  0x85   :  { %v54_v11 = vsel %vm39_vm1, 0.0, %v373_v10  ;;  %v55_v12 = vsel %vm39_vm1, 0.0, %v374_v9 }
  0x86   :  { %v377_v13 = vpop.permute.xlu0 %376  ;;  %v58_v14 = vpack.c.bf16 %v54_v11, %v54_v11  ;;  %v60_v15 = vpack.c.bf16 %v55_v12, %v55_v12 }
  0x87   :  { %v379_v16 = vunpack.i.h.bf16 %v377_v13  ;;  %v378_v17 = vunpack.i.l.bf16 %v377_v13 }
  0x88   :  { %v73_v18 = vsel %vm71_vm2, %v58_v14, 0  ;;  %v116_v19 = vsel %vm71_vm2, %v60_v15, 0 }
  0x89   :  { %v302_v20 = vpack.c.bf16 %v489_v2, %v379_v16  ;;  %v297_v21 = vpack.c.bf16 %v484_v1, %v378_v17  ;;  %329 = vmatpush3.bf16.msra.mxu0 %v73_v18  ;;  %337 = vmatpush3.bf16.msra.mxu1 %v116_v19 }
  0x8a   :  { %330 = vmatprep.subr.bf16.mxu0 %v437_v0  ;;  %338 = vmatprep.subr.bf16.mxu1 %v437_v0 }
  0x8c   :  { %v65_v24 = vpop.permute.xlu1 %64 }
  0x8d   :  { %331 = vmatpush3.bf16.msk.msra.mxu0 %vm510_vm5, %v297_v21  ;;  %339 = vmatpush3.bf16.msk.msra.mxu1 %vm510_vm5, %v302_v20 }
  0x8e   :  { %344 = vmatprep.subr.bf16.mxu0 %v437_v0  ;;  %352 = vmatprep.subr.bf16.mxu1 %v437_v0 }
  0x90   :  { %333 = vmatmul.mubr.msk.bf16.vlgmr.msra.gmra.mxu0 %vm67_vm6, %v56_v23  ;;  %341 = vmatmul.mubr.msk.bf16.vlgmr.msra.gmra.mxu1 %vm67_vm6, %v56_v23 }
  0x91   :  { %348 = vmatprep.mubr.msk.bf16.mxu0 %vm438_vm0, %v437_v0  ;;  %356 = vmatprep.mubr.msk.bf16.mxu1 %vm438_vm0, %v437_v0 }
 0x150   :  { %v109_v25 = vpop.f32.mrf.mxu0  ;;  %v152_v26 = vpop.f32.mrf.mxu1 }
 0x151   :  { %v110_v27 = vadd.f32 %v109_v25, %v65_v24  ;;  %v153_v28 = vadd.f32 %v152_v26, %v65_v24 }
 0x152   :  { %v334_v29 = vpop.f32.mrf.mxu0  ;;  %v342_v30 = vpop.f32.mrf.mxu1 }
 0x153   :  { %v158_v31 = vmax.f32 %v110_v27, 0.0  ;;  %v159_v32 = vmax.f32 %v153_v28, 0.0 }
 0x154   :  { %v112_v33 = vpop.f32.mrf.mxu0  ;;  %v155_v34 = vpop.f32.mrf.mxu1 }
 0x155   :  { %v386_v35 = vpack.i.bf16 %v159_v32, %v158_v31 }
 0x156   :  { %v335_v36 = vpop.f32.mrf.mxu0  ;;  %v343_v37 = vpop.f32.mrf.mxu1 }
 0x157   :  { %387 = vrot.lane.b32.xlu0 %v386_v35, %s441_s0  ;;  %382 = vrot.lane.b32.xlu1 %v386_v35, %s439_s1 }
 0x15b   :  { %180 = vperm.xlu1 %380, %v177_v38  }
 0x1c9   :  { %v383_v39 = vpop.permute.xlu1 %382  ;;  %v388_v42 = vpop.permute.xlu0 %387 }
 0x1ca   :  { %v385_v40 = vunpack.i.h.bf16 %v383_v39  ;;  %v384_v41 = vunpack.i.l.bf16 %v383_v39  ;;  %v390_v47 = vunpack.i.h.bf16 %v388_v42  ;;  %v389_v48 = vunpack.i.l.bf16 %v388_v42 }
 0x1cc   :  { %v171_v43 = vsel %vm39_vm1, 0.0, %v385_v40  ;;  %v170_v44 = vsel %vm39_vm1, 0.0, %v384_v41  ;;  %v312_v51 = vpack.c.bf16 %v159_v32, %v390_v47  ;;  %v307_v52 = vpack.c.bf16 %v158_v31, %v389_v48 }
 0x1cd   :  { %v176_v45 = vpack.c.bf16 %v171_v43, %v171_v43  ;;  %v174_v46 = vpack.c.bf16 %v170_v44, %v170_v44 }
 0x1cf   :  { %v187_v49 = vsel %vm71_vm2, %v174_v46, 0  ;;  %v230_v50 = vsel %vm71_vm2, %v176_v45, 0 }
 0x1d0   :  { %345 = vmatpush3.bf16.msra.mxu0 %v187_v49  ;;  %353 = vmatpush3.bf16.msra.mxu1 %v230_v50 }
 0x1d1   :  { %346 = vmatprep.subr.bf16.mxu0 %v437_v0  ;;  %354 = vmatprep.subr.bf16.mxu1 %v437_v0 }
 0x1d4   :  { %347 = vmatpush3.bf16.msk.msra.mxu0 %vm510_vm5, %v307_v52  ;;  %355 = vmatpush3.bf16.msk.msra.mxu1 %vm510_vm5, %v312_v51 }
 0x1d6   :  { %v181_v54 = vpop.permute.xlu1 %180 }
 0x1d7   :  { %349 = vmatmul.mubr.msk.bf16.vlgmr.msra.gmra.mxu0 %vm67_vm6, %v172_v53  ;;  %357 = vmatmul.mubr.msk.bf16.vlgmr.msra.gmra.mxu1 %vm67_vm6, %v172_v53 }
 0x297   :  { %v223_v55 = vpop.f32.mrf.mxu0  ;;  %v266_v56 = vpop.f32.mrf.mxu1 }
 0x298   :  { %v224_v57 = vadd.f32 %v223_v55, %v181_v54  ;;  %v267_v58 = vadd.f32 %v266_v56, %v181_v54 }
 0x299   :  { %v350_v59 = vpop.f32.mrf.mxu0  ;;  %v358_v60 = vpop.f32.mrf.mxu1 }
 0x29a   :  { %v272_v61 = vadd.f32 %v224_v57, %v484_v1  ;;  %v273_v62 = vadd.f32 %v267_v58, %v489_v2 }
 0x29b   :  { %v226_v63 = vpop.f32.mrf.mxu0  ;;  %v269_v0 = vpop.f32.mrf.mxu1 }
 0x29c   :  { %v274_v3 = vmax.f32 %v272_v61, 0.0  ;;  %v275_v4 = vmax.f32 %v273_v62, 0.0 }
 0x29d   :  { %v351_v5 = vpop.f32.mrf.mxu0  ;;  %v359_v6 = vpop.f32.mrf.mxu1 }
 0x29e   :  { %276 = vst [vmem:[#allocation5] sm:$0xff] %v274_v3  ;;  %277 = vst [vmem:[#allocation5 + $0x8] sm:$0xff] %v275_v4 }
 0x29f   :  { %423 = shalt.err (!%p420_p9)
}
 0x2a0   :  { %s444_s8 = smov 128   ;;  %s445_s9 = smov 8  }
 0x2a1   :  { %289 = dma.vmem_to_hbm [thread:$0]  %s284_s7, 256, %s556_s5, [#allocation4], %s444_s8, %s444_s8, %s445_s9  }
 0x2a2   :  { %434 = dma.done.wait [#allocation4], 256  }
 0x2a3   :  { %435 = vsyncadd [#allocation4], 4294967040 }
 0x2a4   :  { %293 = vsyncpa [#allocation3], 1 }
 0x2a5   :  { %294 = vsyncpa [#allocation4], 1 }

</bundles_post_ra>
